<compile_context>
chip_gen: v7x
topology: tpu7x:2x2x1
jax: 0.10.0
libtpu: 0.0.40
codegen_flags: <defaults>
</compile_context>

<pallas_src>
import jax
import jax.numpy as jnp
from jax.experimental import pallas as pl
from jax.experimental.pallas import tpu as pltpu


_LANE = 128
_SUBLANE = 8

_VMEM_BUDGET = 40 * 1024 * 1024     # conservative per-core working-set budget (v7x: 64 MiB/TC)
_VMEM_LIMIT = 48 * 1024 * 1024      # scoped VMEM limit handed to the compiler
_MIN_ROWS_FOR_SPLIT = 64            # force a >= 2-tile grid above this (2 TCs on v7x)


def _round_up(n, m):
    return ((n + m - 1) // m) * m


def _cdiv(a, b):
    return -(-a // b)


# ----------------------------------------------------------------------------
# Fused kernel: all layers in one body, intermediates never leave VMEM/vregs
# ----------------------------------------------------------------------------
def _make_fused_kernel(n_layers, padded_out_dims, act, raw_last_layer):
    """kernel(x_ref, w0_ref, ..., wN_ref, b_packed_ref, o_ref)."""

    def kernel(*refs):
        x_ref = refs[0]
        w_refs = refs[1:1 + n_layers]
        b_ref = refs[1 + n_layers]
        o_ref = refs[2 + n_layers]

        h = x_ref[...]                                   # (bm, F_in_pad)
        for i in range(n_layers):
            f_out_pad = padded_out_dims[i]
            # bf16 operands, f32 accumulation on the MXU.
            y = jnp.dot(h.astype(jnp.bfloat16), w_refs[i][...],
                        preferred_element_type=jnp.float32)
            # Packed bias row i, lane-aligned static slice; broadcasts over rows (f32).
            y = y + b_ref[i:i + 1, :f_out_pad]
            is_last = i == n_layers - 1
            if raw_last_layer and is_last:
                h = y
            elif act == "sigmoid":
                # sigmoid(y) == 0.5*tanh(0.5*y) + 0.5 : single EUP push per element.
                h = 0.5 * jnp.tanh(0.5 * y) + 0.5
            elif act == "relu":
                h = jnp.maximum(y, 0.0)
            else:                                        # identity
                h = y
        o_ref[...] = h.astype(o_ref.dtype)

    return kernel


# ----------------------------------------------------------------------------
# One-time parameter packing (call at init / after each param update, NOT per fwd)
# ----------------------------------------------------------------------------
class PackedUserEncoderParams:
    def __init__(self, weights, bias, f_in, f_in_pad, out_pads, out_dims):
        self.weights = tuple(weights)    # bf16, lane/sublane padded, (prev_pad, fo_pad)
        self.bias = bias                 # f32, (n_layers, f_max_pad)
        self.f_in = f_in
        self.f_in_pad = f_in_pad
        self.out_pads = tuple(out_pads)
        self.out_dims = tuple(out_dims)


def pack_user_encoder_params(params, in_features):
    """Zero-pad weights to lane multiples (bf16) and pack biases into one f32 array."""
    n_layers = len(params)
    f_in_pad = _round_up(in_features, _LANE)

    weights, out_pads, out_dims = [], [], []
    prev_pad = f_in_pad
    for (w, b) in params:
        fi, fo = w.shape
        fo_pad = _round_up(fo, _LANE)
        w_pad = jnp.zeros((prev_pad, fo_pad), jnp.bfloat16)
        w_pad = w_pad.at[:fi, :fo].set(w.astype(jnp.bfloat16))
        weights.append(w_pad)
        out_pads.append(fo_pad)
        out_dims.append(fo)
        prev_pad = fo_pad

    f_max_pad = max(out_pads)
    bias = jnp.zeros((n_layers, f_max_pad), jnp.float32)
    for i, (w, b) in enumerate(params):
        fo = w.shape[1]
        bias = bias.at[i, :fo].set(b.reshape(-1).astype(jnp.float32))

    return PackedUserEncoderParams(weights, bias, in_features, f_in_pad,
                                   out_pads, out_dims)


# ----------------------------------------------------------------------------
# UserEncoder forward (one fused pallas_call)
# ----------------------------------------------------------------------------
def user_encoder_forward(x, packed, f="sigmoid", raw_last_layer=False,
                         block_batch=1024):
    if f not in ("sigmoid", "relu", "identity"):
        raise ValueError(f"Got invalid function name for f : {f}")

    B, F_in = x.shape
    if F_in != packed.f_in:
        raise ValueError("input feature dim does not match packed params")

    n_layers = len(packed.weights)
    f_in_pad = packed.f_in_pad
    out_pads = packed.out_pads
    f_out_pad_last = out_pads[-1]
    f_out_last = packed.out_dims[-1]

    # Input: pad ONLY the lane dim, fused with the bf16 downcast; skip entirely when
    # F_in is already lane-aligned (the kernel casts at the dot instead).
    if F_in != f_in_pad:
        x_in = jnp.zeros((B, f_in_pad), jnp.bfloat16).at[:, :F_in].set(
            x.astype(jnp.bfloat16))
    else:
        x_in = x
    in_item_bytes = x_in.dtype.itemsize

    # Batch tiling: balance tiles over the real batch, clamp bm by a VMEM budget.
    fixed_bytes = (2 * sum(int(w.size) * 2 for w in packed.weights)     # dbl-buffered bf16 weights
                   + 2 * int(packed.bias.size) * 4)                     # dbl-buffered f32 biases
    per_row_bytes = (2 * f_in_pad * in_item_bytes                       # dbl-buffered x tile
                     + 2 * f_out_pad_last * 4                           # dbl-buffered out tile
                     + 4 * (f_in_pad + sum(out_pads)))                  # live f32 intermediates
    num_tiles = max(1, _cdiv(B, block_batch))
    if num_tiles == 1 and B >= _MIN_ROWS_FOR_SPLIT:
        num_tiles = 2                                                   # use both TCs on v7x
    bm = _round_up(_cdiv(B, num_tiles), _SUBLANE)
    avail = _VMEM_BUDGET - fixed_bytes
    if avail >= per_row_bytes * _SUBLANE:
        vmem_rows = (avail // per_row_bytes) // _SUBLANE * _SUBLANE
    else:
        vmem_rows = _SUBLANE
    bm = max(_SUBLANE, min(bm, vmem_rows))
    num_tiles = _cdiv(B, bm)

    kernel = _make_fused_kernel(n_layers, out_pads, f, raw_last_layer)
    out_shape = jax.ShapeDtypeStruct((B, f_out_pad_last), jnp.float32)

    # Advisory cost estimate for XLA scheduling.
    rows = num_tiles * bm
    flops, prev = 0, f_in_pad
    for p in out_pads:
        flops += 2 * rows * prev * p
        prev = p
    n_act = n_layers - 1 if raw_last_layer else n_layers
    transc = rows * sum(out_pads[:n_act]) if f == "sigmoid" else 0
    bytes_acc = (B * f_in_pad * in_item_bytes
                 + sum(int(w.size) * 2 for w in packed.weights)
                 + int(packed.bias.size) * 4
                 + B * f_out_pad_last * 4)
    cost = pl.CostEstimate(flops=flops, transcendentals=transc,
                           bytes_accessed=bytes_acc)

    if num_tiles == 1:
        # Tiny batch: single block, no grid, no pipeline prologue/epilogue.
        out_pad = pl.pallas_call(
            kernel,
            out_shape=out_shape,
            compiler_params=pltpu.CompilerParams(vmem_limit_bytes=_VMEM_LIMIT),
            cost_estimate=cost,
        )(x_in, *packed.weights, packed.bias)
    else:
        # Batch-tiled: stream activations; bf16 weights + f32 biases stay VMEM-resident.
        in_specs = [pl.BlockSpec((bm, f_in_pad), lambda i: (i, 0))]
        for w in packed.weights:
            in_specs.append(pl.BlockSpec(w.shape, lambda i: (0, 0)))
        in_specs.append(pl.BlockSpec(packed.bias.shape, lambda i: (0, 0)))
        out_pad = pl.pallas_call(
            kernel,
            out_shape=out_shape,
            grid=(num_tiles,),
            in_specs=in_specs,
            out_specs=pl.BlockSpec((bm, f_out_pad_last), lambda i: (i, 0)),
            compiler_params=pltpu.CompilerParams(
                dimension_semantics=("parallel",),
                vmem_limit_bytes=_VMEM_LIMIT),
            cost_estimate=cost,
        )(x_in, *packed.weights, packed.bias)

    # TODO(synk): if the consumer can take the lane-padded (., 128) layout, return
    # out_pad directly and fuse this narrowing slice into the consumer.
    return out_pad[:, :f_out_last]


# ----------------------------------------------------------------------------
# Deterministic parameter init (PyTorch nn.Linear-style uniform bounds)
# ----------------------------------------------------------------------------
def init_user_encoder_params(key, in_features, layer_sizes):
    params = []
    fan_in = in_features
    for out_features in layer_sizes:
        key, kw, kb = jax.random.split(key, 3)
        bound = 1.0 / jnp.sqrt(jnp.float32(fan_in))
        # stored already transposed: (in_features, out_features)
        w = jax.random.uniform(
            kw, (fan_in, out_features), jnp.float32, minval=-bound, maxval=bound)
        b = jax.random.uniform(
            kb, (out_features,), jnp.float32, minval=-bound, maxval=bound)
        params.append((w, b))
        fan_in = out_features
    return params


# ----------------------------------------------------------------------------
# Pure-JAX f32 reference
# ----------------------------------------------------------------------------
def _reference_forward(x, params, f, raw_last_layer):
    x = x.astype(jnp.float32)
    n = len(params)
    for i, (w, b) in enumerate(params):
        y = x @ w + b.reshape(1, -1)
        if raw_last_layer and i == n - 1:
            x = y
        elif f == "sigmoid":
            x = jax.nn.sigmoid(y)
        elif f == "relu":
            x = jnp.maximum(y, 0.0)
        else:
            x = y
    return x


if __name__ == "__main__":
    key = jax.random.PRNGKey(0)
    k_x, k_p, k_med, k_big = jax.random.split(key, 4)

    batch = 2
    in_features = 32
    layer_sizes = [16, 8]
    f = "sigmoid"

    x = jax.random.normal(k_x, (batch, in_features), jnp.float32)
    params = init_user_encoder_params(k_p, in_features, layer_sizes)
    packed = pack_user_encoder_params(params, in_features)   # packed ONCE, reused below

    # bf16 matmul operands -> relaxed tolerances vs the f32 reference.
    ATOL, RTOL = 2e-2, 2e-2

    # 1) Small batch: single-block (gridless) fused kernel.
    out = jax.block_until_ready(user_encoder_forward(x, packed, f=f))
    ref = _reference_forward(x, params, f, raw_last_layer=False)
    assert out.shape == (batch, layer_sizes[-1])
    assert jnp.allclose(out, ref, atol=ATOL, rtol=RTOL)

    # 2) raw_last_layer branch.
    out_raw = jax.block_until_ready(
        user_encoder_forward(x, packed, f=f, raw_last_layer=True))
    ref_raw = _reference_forward(x, params, f, raw_last_layer=True)
    assert jnp.allclose(out_raw, ref_raw, atol=3e-2, rtol=3e-2)

    # 3) Medium batch: forced 2-tile "parallel" grid (both TCs on v7x) with a
    #    non-dividing last tile absorbed by the grid (no wrapper row pad).
    xm = jax.random.normal(k_med, (100, in_features), jnp.float32)
    out_m = jax.block_until_ready(user_encoder_forward(xm, packed, f="relu"))
    ref_m = _reference_forward(xm, params, "relu", raw_last_layer=False)
    assert out_m.shape == (100, layer_sizes[-1])
    assert jnp.allclose(out_m, ref_m, atol=ATOL, rtol=RTOL)

    # 4) Large batch: batch-tiled grid, VMEM-resident bf16 weights.
    xb = jax.random.normal(k_big, (1024, in_features), jnp.float32)
    out_b = jax.block_until_ready(
        user_encoder_forward(xb, packed, f=f, block_batch=256))
    ref_b = _reference_forward(xb, params, f, raw_last_layer=False)
    assert out_b.shape == (1024, layer_sizes[-1])
    assert jnp.allclose(out_b, ref_b, atol=ATOL, rtol=RTOL)

    print("KERNEL_OK")
</pallas_src>

<mosaic_0001>
module attributes {stable_mosaic.version = 11 : i64} {
  func.func @kernel(%arg0: memref<2x128xbf16, #tpu.memory_space<vmem>>, %arg1: memref<128x128xbf16, #tpu.memory_space<vmem>>, %arg2: memref<128x128xbf16, #tpu.memory_space<vmem>>, %arg3: memref<2x128xf32, #tpu.memory_space<vmem>>, %arg4: memref<2x128xf32, #tpu.memory_space<vmem>>) attributes {dimension_semantics = [], scalar_prefetch = 0 : i64, scratch_operands = 0 : i64, tpu.core_type = #tpu.core_type<tc>} {
    %c0 = arith.constant 0 : index
    %c0_0 = arith.constant 0 : index
    %0 = vector.load %arg0[%c0, %c0_0] : memref<2x128xbf16, #tpu.memory_space<vmem>>, vector<2x128xbf16>
    %c0_1 = arith.constant 0 : index
    %c0_2 = arith.constant 0 : index
    %1 = vector.load %arg1[%c0_1, %c0_2] : memref<128x128xbf16, #tpu.memory_space<vmem>>, vector<128x128xbf16>
    %cst = arith.constant dense<0.000000e+00> : vector<2x128xf32>
    %2 = tpu.matmul %0, %1, %cst {dimension_numbers = #tpu.dot_dimension_numbers<[1], [0], [0], [1], [0, 0, 1, 1], [], []>} : vector<2x128xbf16>, vector<128x128xbf16>, vector<2x128xf32> -> vector<2x128xf32>
    %c0_3 = arith.constant 0 : index
    %c0_4 = arith.constant 0 : index
    %3 = vector.load %arg3[%c0_3, %c0_4] : memref<2x128xf32, #tpu.memory_space<vmem>>, vector<1x128xf32>
    %4 = vector.broadcast %3 : vector<1x128xf32> to vector<2x128xf32>
    %5 = arith.addf %2, %4 : vector<2x128xf32>
    %cst_5 = arith.constant 5.000000e-01 : f32
    %6 = vector.broadcast %cst_5 : f32 to vector<2x128xf32>
    %7 = arith.mulf %6, %5 : vector<2x128xf32>
    %8 = math.tanh %7 : vector<2x128xf32>
    %cst_6 = arith.constant 5.000000e-01 : f32
    %9 = vector.broadcast %cst_6 : f32 to vector<2x128xf32>
    %10 = arith.mulf %9, %8 : vector<2x128xf32>
    %cst_7 = arith.constant 5.000000e-01 : f32
    %11 = vector.broadcast %cst_7 : f32 to vector<2x128xf32>
    %12 = arith.addf %10, %11 : vector<2x128xf32>
    %13 = arith.truncf %12 : vector<2x128xf32> to vector<2x128xbf16>
    %c0_8 = arith.constant 0 : index
    %c0_9 = arith.constant 0 : index
    %14 = vector.load %arg2[%c0_8, %c0_9] : memref<128x128xbf16, #tpu.memory_space<vmem>>, vector<128x128xbf16>
    %cst_10 = arith.constant dense<0.000000e+00> : vector<2x128xf32>
    %15 = tpu.matmul %13, %14, %cst_10 {dimension_numbers = #tpu.dot_dimension_numbers<[1], [0], [0], [1], [0, 0, 1, 1], [], []>} : vector<2x128xbf16>, vector<128x128xbf16>, vector<2x128xf32> -> vector<2x128xf32>
    %c1 = arith.constant 1 : index
    %c0_11 = arith.constant 0 : index
    %16 = vector.load %arg3[%c1, %c0_11] : memref<2x128xf32, #tpu.memory_space<vmem>>, vector<1x128xf32>
    %17 = vector.broadcast %16 : vector<1x128xf32> to vector<2x128xf32>
    %18 = arith.addf %15, %17 : vector<2x128xf32>
    %cst_12 = arith.constant 5.000000e-01 : f32
    %19 = vector.broadcast %cst_12 : f32 to vector<2x128xf32>
    %20 = arith.mulf %19, %18 : vector<2x128xf32>
    %21 = math.tanh %20 : vector<2x128xf32>
    %cst_13 = arith.constant 5.000000e-01 : f32
    %22 = vector.broadcast %cst_13 : f32 to vector<2x128xf32>
    %23 = arith.mulf %22, %21 : vector<2x128xf32>
    %cst_14 = arith.constant 5.000000e-01 : f32
    %24 = vector.broadcast %cst_14 : f32 to vector<2x128xf32>
    %25 = arith.addf %23, %24 : vector<2x128xf32>
    %c0_15 = arith.constant 0 : index
    %c0_16 = arith.constant 0 : index
    %26 = vector.load %arg4[%c0_15, %c0_16] : memref<2x128xf32, #tpu.memory_space<vmem>>, vector<2x128xf32>
    tpu.vector_store %arg4[%c0_15, %c0_16], %25 {strides = array<i32>} : memref<2x128xf32, #tpu.memory_space<vmem>>, vector<2x128xf32>,
    return
  }
}

</mosaic_0001>

<bundles_post_ra>
// kernel: tpu_custom_call.1
= control target key start
LH: loop header
LB: loop body
LE: loop exit
PB: predicated region body
PF: predicated region fallthrough
CT: control target
= control target key end

     0   :  { %9 = vsyncpa [#allocation3], 0  ;;  %s594_s0 = inlined_call_operand.hbm [shape: bf16[2,128], index: 0, kind: input, shape index: {}]   ;;  %s595_s1 = inlined_call_operand.hbm [shape: bf16[128,128], index: 1, kind: input, shape index: {}]   ;;  %s596_s2 = inlined_call_operand.hbm [shape: bf16[128,128], index: 2, kind: input, shape index: {}]   ;;  %s597_s3 = inlined_call_operand.vmem [shape: f32[2,128], index: 3, kind: input, shape index: {}]   ;;  %s598_s4 = inlined_call_operand.hbm [shape: f32[2,128], index: 4, kind: output, shape index: {}]  }
   0x1   :  { %10 = vsyncpa [#allocation6], 0 }
   0x2   :  { %11 = vsyncpa [#allocation4], 0  ;;  %s501_s15 = smov [#allocation5]   ;;  %s407_s19 = scalar_lea.hbm %s595_s1, 1024 }
   0x3   :  { %s27_s16 = sshll.u32 %s501_s15, 4  ;;  %p408_p0 = scmp.ne.s32.totalorder %s595_s1, %s407_s19  ;;  %s28_s16 = int_to_ptr.vmem [resolvable:$true] %s27_s16 }
   0x4   :  { %p411_p1 = scmp.lt.u32.totalorder %s407_s19, %s595_s1 }
   0x6   :  { %p413_p2 = pnand %p411_p1, %p408_p0 }
   0x8   :  { %416 = shalt.err (!%p413_p2)
}
   0x9   :  { %s417_s24 = scalar_lea.vmem %s28_s16, 1024  ;;  %p422_p4 = scmp.lt.s32.totalorder %s28_s16, %s28_s16 }
   0xa   :  { %p418_p3 = scmp.ne.s32.totalorder %s28_s16, %s417_s24  ;;  %p423_p5 = scmp.lt.s32.totalorder %s417_s24, %s417_s24 }
   0xc   :  { %p424_p6 = por %p423_p5, %p422_p4 }
   0xe   :  { %p425_p7 = pnand %p424_p6, %p418_p3 }
  0x10   :  { %428 = shalt.err (!%p425_p7)
}
  0x11   :  { %s502_s25 = smov 64   ;;  %s503_s26 = smov 4  }
  0x12   :  { %33 = dma.hbm_to_vmem [thread:$0]  %s595_s1, 1024, %s28_s16, [#allocation6], %s502_s25, %s502_s25, %s503_s26  }
  0x13   :  { %s504_s29 = smov [#allocation2]   ;;  %s505_s5 = smov [#allocation7]  }
  0x14   :  { %s18_s30 = sshll.u32 %s504_s29, 4  ;;  %s39_s6 = sshll.u32 %s505_s5, 4  ;;  %s19_s30 = int_to_ptr.vmem [resolvable:$true] %s18_s30  ;;  %s40_s6 = int_to_ptr.vmem [resolvable:$true] %s39_s6 }
  0x15   :  { %s429_s9 = scalar_lea.hbm %s594_s0, 16 }
  0x16   :  { %p430_p8 = scmp.ne.s32.totalorder %s594_s0, %s429_s9  ;;  %p433_p9 = scmp.lt.u32.totalorder %s429_s9, %s594_s0 }
  0x18   :  { %p435_p10 = pnand %p433_p9, %p430_p8 }
  0x1a   :  { %438 = shalt.err (!%p435_p10)
}
  0x1b   :  { %s439_s1 = scalar_lea.vmem %s19_s30, 16  ;;  %s443_s14 = scalar_lea.vmem %s19_s30, 32 }
  0x1c   :  { %p440_p11 = scmp.ne.s32.totalorder %s19_s30, %s439_s1  ;;  %p444_p12 = scmp.lt.s32.totalorder %s19_s30, %s19_s30 }
  0x1d   :  { %p445_p13 = scmp.lt.s32.totalorder %s443_s14, %s439_s1 }
  0x1f   :  { %p446_p0 = por %p445_p13, %p444_p12 }
  0x21   :  { %p447_p1 = pnand %p446_p0, %p440_p11 }
  0x23   :  { %450 = shalt.err (!%p447_p1)
}
  0x24   :  { %21 = dma.hbm_to_vmem [thread:$0]  %s594_s0, 16, %s19_s30, [#allocation3]  }
  0x25   :  { %s451_s19 = scalar_lea.hbm %s596_s2, 1024 }
  0x26   :  { %p452_p2 = scmp.ne.s32.totalorder %s596_s2, %s451_s19  ;;  %p455_p3 = scmp.lt.u32.totalorder %s451_s19, %s596_s2 }
  0x28   :  { %p457_p4 = pnand %p455_p3, %p452_p2 }
  0x2a   :  { %460 = shalt.err (!%p457_p4)
}
  0x2b   :  { %s461_s24 = scalar_lea.vmem %s40_s6, 1024  ;;  %p466_p6 = scmp.lt.s32.totalorder %s40_s6, %s40_s6 }
  0x2c   :  { %p462_p5 = scmp.ne.s32.totalorder %s40_s6, %s461_s24  ;;  %p467_p7 = scmp.lt.s32.totalorder %s461_s24, %s461_s24 }
  0x2e   :  { %p468_p8 = por %p467_p7, %p466_p6 }
  0x30   :  { %p469_p9 = pnand %p468_p8, %p462_p5 }
  0x32   :  { %472 = shalt.err (!%p469_p9)
}
  0x33   :  { %45 = dma.hbm_to_vmem [thread:$0]  %s596_s2, 1024, %s40_s6, [#allocation6], %s502_s25, %s502_s25, %s503_s26  }
  0x34   :  { %495 = dma.done.wait [#allocation3], 16  }
  0x35   :  { %496 = vsyncadd [#allocation3], 4294967280 }
  0x36   :  { %497 = dma.done.wait [#allocation6], 2048  }
  0x37   :  { %498 = vsyncadd [#allocation6], 4294965248  ;;  %v506_v0 = vmov 0.0   ;;  %vm507_vm0 = vmmov 0   ;;  %v387_v1 = vld [vmem:[#allocation5] sm:$0xff]   ;;  %v388_v2 = vld [vmem:[#allocation5 + $0x8] sm:$0xff]  }
  0x38   :  { %339 = vmatprep.subr.bf16.mxu0 %v506_v0  ;;  %355 = vmatprep.mubr.msk.bf16.mxu0 %vm507_vm0, %v506_v0  ;;  %v389_v3 = vld [vmem:[#allocation5 + $0x10] sm:$0xff]   ;;  %v395_v4 = vld [vmem:[#allocation7] sm:$0xff]   ;;  %v390_v5 = vld [vmem:[#allocation5 + $0x18] sm:$0xff]   ;;  %s508_s29 = smov [#allocation8]  }
  0x39   :  { %359 = vmatprep.subr.bf16.mxu1 %v506_v0  ;;  %375 = vmatprep.mubr.msk.bf16.mxu1 %vm507_vm0, %v506_v0  ;;  %v396_v6 = vld [vmem:[#allocation7 + $0x8] sm:$0xff]   ;;  %v391_v7 = vld [vmem:[#allocation5 + $0x20] sm:$0xff]   ;;  %v397_v8 = vld [vmem:[#allocation7 + $0x10] sm:$0xff]   ;;  %s293_s30 = sshll.u32 %s508_s29, 4  ;;  %s294_s30 = int_to_ptr.vmem [resolvable:$true] %s293_s30 }
  0x3a   :  { %340 = vmatpush3.bf16.msra.mxu0 %v387_v1  ;;  %360 = vmatpush3.bf16.msra.mxu1 %v395_v4  ;;  %v392_v9 = vld [vmem:[#allocation5 + $0x28] sm:$0xff]   ;;  %v393_v10 = vld [vmem:[#allocation5 + $0x30] sm:$0xff]   ;;  %v394_v11 = vld [vmem:[#allocation5 + $0x38] sm:$0xff]   ;;  %s473_s5 = scalar_lea.vmem %s294_s30, 32  ;;  %p478_p11 = scmp.lt.s32.totalorder %s294_s30, %s294_s30 }
  0x3b   :  { %341 = vmatprep.subr.bf16.mxu0 %v506_v0  ;;  %361 = vmatprep.subr.bf16.mxu1 %v506_v0  ;;  %v58_v12 = vld [vmem:[#allocation2] sm:$0x1]  ;;  %v399_v14 = vld [vmem:[#allocation7 + $0x20] sm:$0xff]   ;;  %v400_v15 = vld [vmem:[#allocation7 + $0x28] sm:$0xff]   ;;  %p474_p10 = scmp.ne.s32.totalorder %s294_s30, %s473_s5  ;;  %p479_p12 = scmp.lt.s32.totalorder %s473_s5, %s473_s5 }
  0x3c   :  { %v398_v13 = vld [vmem:[#allocation7 + $0x18] sm:$0xff]   ;;  %v401_v16 = vld [vmem:[#allocation7 + $0x30] sm:$0xff]  }
  0x3d   :  { %v402_v17 = vld [vmem:[#allocation7 + $0x38] sm:$0xff]   ;;  %v303_v18 = vld [vmem:[%s597_s3] ss:$0 sm:$0xff]  ;;  %v312_v29 = vld [vmem:[%s597_s3 + $0x1] ss:$0 sm:$0xff]  ;;  %p480_p13 = por %p479_p12, %p478_p11 }
  0x3e   :  { %342 = vmatpush3.bf16.msra.mxu0 %v388_v2  ;;  %362 = vmatpush3.bf16.msra.mxu1 %v396_v6 }
  0x3f   :  { %343 = vmatprep.subr.bf16.mxu0 %v506_v0  ;;  %363 = vmatprep.subr.bf16.mxu1 %v506_v0  ;;  %p481_p0 = pnand %p480_p13, %p474_p10 }
  0x42   :  { %344 = vmatpush3.bf16.msra.mxu0 %v389_v3  ;;  %364 = vmatpush3.bf16.msra.mxu1 %v397_v8 }
  0x43   :  { %345 = vmatprep.subr.bf16.mxu0 %v506_v0  ;;  %365 = vmatprep.subr.bf16.mxu1 %v506_v0 }
  0x46   :  { %346 = vmatpush3.bf16.msra.mxu0 %v390_v5  ;;  %366 = vmatpush3.bf16.msra.mxu1 %v398_v13 }
  0x47   :  { %347 = vmatprep.subr.bf16.mxu0 %v506_v0  ;;  %367 = vmatprep.subr.bf16.mxu1 %v506_v0 }
  0x4a   :  { %348 = vmatpush3.bf16.msra.mxu0 %v391_v7  ;;  %368 = vmatpush3.bf16.msra.mxu1 %v399_v14 }
  0x4b   :  { %349 = vmatprep.subr.bf16.mxu0 %v506_v0  ;;  %369 = vmatprep.subr.bf16.mxu1 %v506_v0 }
  0x4e   :  { %350 = vmatpush3.bf16.msra.mxu0 %v392_v9  ;;  %370 = vmatpush3.bf16.msra.mxu1 %v400_v15 }
  0x4f   :  { %351 = vmatprep.subr.bf16.mxu0 %v506_v0  ;;  %371 = vmatprep.subr.bf16.mxu1 %v506_v0 }
  0x52   :  { %352 = vmatpush3.bf16.msra.mxu0 %v393_v10  ;;  %372 = vmatpush3.bf16.msra.mxu1 %v401_v16 }
  0x53   :  { %353 = vmatprep.subr.bf16.mxu0 %v506_v0  ;;  %373 = vmatprep.subr.bf16.mxu1 %v506_v0 }
  0x56   :  { %354 = vmatpush3.bf16.msra.mxu0 %v394_v11  ;;  %374 = vmatpush3.bf16.msra.mxu1 %v402_v17 }
  0x59   :  { %356 = vmatmul.mubr.bf16.vlgmr.msra.gmra.mrb[0].mxu0 %v58_v12 }
 0x12c   :  { %v162_v19 = vpop.f32.mrb[0].mxu0 }
 0x12d   :  { %v163_v20 = vadd.f32 %v303_v18, %v162_v19  ;;  %v357_v21 = vpop.f32.mrb[1].mxu0 }
 0x12e   :  { %v165_v22 = vpop.f32.mrb[2].mxu0 }
 0x12f   :  { %v168_v23 = vmul.f32 0.5, %v163_v20  ;;  %v358_v24 = vpop.f32.mrb[3].mxu0 }
 0x131   :  { %403 = vtanh.f32 %v168_v23 }
 0x13b   :  { %v404_v25 = vpop.eup %403 }
 0x13c   :  { %v170_v26 = vmul.f32 0.5, %v404_v25 }
 0x13e   :  { %v171_v27 = vadd.f32 0.5, %v170_v26 }
 0x140   :  { %v172_v28 = vpack.c.bf16 %v171_v27, %v171_v27 }
 0x142   :  { %376 = vmatmul.mubr.bf16.vlgmr.msra.gmra.mrb[0].mxu1 %v172_v28 }
 0x215   :  { %v276_v30 = vpop.f32.mrb[0].mxu1 }
 0x216   :  { %v277_v31 = vadd.f32 %v312_v29, %v276_v30  ;;  %v377_v32 = vpop.f32.mrb[1].mxu1 }
 0x217   :  { %v279_v33 = vpop.f32.mrb[2].mxu1 }
 0x218   :  { %v282_v34 = vmul.f32 0.5, %v277_v31  ;;  %v378_v35 = vpop.f32.mrb[3].mxu1 }
 0x21a   :  { %405 = vtanh.f32 %v282_v34 }
 0x224   :  { %v406_v36 = vpop.eup %405 }
 0x225   :  { %v284_v37 = vmul.f32 0.5, %v406_v36 }
 0x227   :  { %v285_v38 = vadd.f32 0.5, %v284_v37 }
 0x229   :  { %286 = vst [vmem:[#allocation8] sm:$0x3] %v285_v38 }
 0x22a   :  { %484 = shalt.err (!%p481_p0)
}
 0x22b   :  { %s485_s7 = scalar_lea.hbm %s598_s4, 32 }
 0x22c   :  { %p486_p1 = scmp.ne.s32.totalorder %s598_s4, %s485_s7  ;;  %p489_p2 = scmp.lt.u32.totalorder %s485_s7, %s598_s4 }
 0x22e   :  { %p491_p3 = pnand %p489_p2, %p486_p1 }
 0x230   :  { %494 = shalt.err (!%p491_p3)
}
 0x231   :  { %296 = dma.vmem_to_hbm [thread:$0]  %s294_s30, 32, %s598_s4, [#allocation4]  }
 0x232   :  { %499 = dma.done.wait [#allocation4], 32  }
 0x233   :  { %500 = vsyncadd [#allocation4], 4294967264 }
 0x234   :  { %300 = vsyncpa [#allocation3], 1 }
 0x235   :  { %301 = vsyncpa [#allocation6], 1 }
 0x236   :  { %302 = vsyncpa [#allocation4], 1 }

</bundles_post_ra>
